<compile_context>
chip_gen: v7x
topology: tpu7x:2x2x1
jax: 0.10.0
libtpu: 0.0.40
codegen_flags: <defaults>
</compile_context>

<pallas_src>
import functools

import jax
import jax.numpy as jnp
from jax.experimental import pallas as pl
from jax.experimental.pallas import tpu as pltpu


def _spatial_attention_kernel(x_ref, w1_ref, w2_ref, o_ref, *, height, width):
    """SpatialAttention forward for a block of Nb images (flattened H*W lanes).

    x_ref : (Nb, C, H*W) VMEM, f32
    w1_ref: (36,) SMEM -- conv1 weight (2, 2, 3, 3) OIHW, flattened row-major
    w2_ref: (18,) SMEM -- conv2 weight (1, 2, 3, 3) OIHW, flattened row-major
    o_ref : (Nb, 1, H*W) VMEM, f32
    """
    nb, c, hw = x_ref.shape
    h, w = height, width

    # --- fused channel mean & max: one pass over C, one VMEM read per plane ---
    x0 = x_ref[:, 0, :]
    s = x0
    m = x0
    for ci in range(1, c):
        xc = x_ref[:, ci, :]
        s = s + xc
        m = jnp.maximum(m, xc)
    avg = s * (1.0 / c)

    # --- edge masks for SAME padding in the flattened row-major layout ---
    idx = jax.lax.broadcasted_iota(jnp.int32, (nb, hw), 1)
    col = idx % w
    not_last_col = col != (w - 1)        # valid source exists for dx = +1
    not_first_col = col != 0             # valid source exists for dx = -1
    not_last_row = idx < (h - 1) * w     # valid source exists for dy = +1
    not_first_row = idx >= w             # valid source exists for dy = -1

    def shift_cols(p, dx):
        # q[..., i] = p[..., i + dx] within the same image row, else 0.
        if dx == 0:
            return p
        q = pltpu.roll(p, (-dx) % hw, axis=1)
        return jnp.where(not_last_col if dx > 0 else not_first_col, q, 0.0)

    def shift_rows(p, dy):
        # q[..., i] = p[..., i + dy*W]  (row y+dy, same column), else 0.
        if dy == 0:
            return p
        q = pltpu.roll(p, (-dy * w) % hw, axis=1)
        return jnp.where(not_last_row if dy > 0 else not_first_row, q, 0.0)

    def conv3x3_same(planes, w_ref, n_out):
        """3x3 'SAME' conv (no bias) over a list of (Nb, H*W) input planes."""
        n_in = len(planes)
        # Column shifts (XLU rolls), shared across output channels & kernel rows.
        col_sh = [[shift_cols(p, dx) for dx in (-1, 0, 1)] for p in planes]
        outs = []
        for o in range(n_out):
            acc = None
            for ky, dy in enumerate((-1, 0, 1)):
                # Fold this kernel row's 3*n_in taps on the VPU (scalar FMAs)...
                t = None
                for i in range(n_in):
                    for kx in range(3):
                        wgt = w_ref[((o * n_in + i) * 3 + ky) * 3 + kx]
                        term = wgt * col_sh[i][kx]
                        t = term if t is None else t + term
                # ... then a single row shift on the XLU.
                rt = shift_rows(t, dy)
                acc = rt if acc is None else acc + rt
            outs.append(acc)
        return outs

    y1 = conv3x3_same([avg, m], w1_ref, n_out=2)     # conv1: 2 -> 2
    (y2,) = conv3x3_same(y1, w2_ref, n_out=1)        # conv2: 2 -> 1
    o_ref[:, 0, :] = (1.0 / (1.0 + jnp.exp(-y2))).astype(o_ref.dtype)


def spatial_attention_pallas(x, w1, w2, *, block_n=8):
    """x: (N, C, H, W) f32; w1: (2,2,3,3) OIHW; w2: (1,2,3,3) OIHW (bias-free)."""
    N, C, H, W = x.shape
    HW = H * W
    x_flat = x.reshape(N, C, HW)                 # free reshape, lane-dense last dim
    w1_flat = w1.reshape(-1).astype(jnp.float32)
    w2_flat = w2.reshape(-1).astype(jnp.float32)

    nb = max(1, min(block_n, N))                 # images per grid step
    grid = (pl.cdiv(N, nb),)

    kernel = functools.partial(_spatial_attention_kernel, height=H, width=W)

    out_flat = pl.pallas_call(
        kernel,
        out_shape=jax.ShapeDtypeStruct((N, 1, HW), x.dtype),
        grid=grid,
        in_specs=[
            pl.BlockSpec((nb, C, HW), lambda n: (n, 0, 0)),
            pl.BlockSpec(memory_space=pltpu.MemorySpace.SMEM),
            pl.BlockSpec(memory_space=pltpu.MemorySpace.SMEM),
        ],
        out_specs=pl.BlockSpec((nb, 1, HW), lambda n: (n, 0, 0)),
        compiler_params=pltpu.CompilerParams(
            dimension_semantics=("parallel",)),
    )(x_flat, w1_flat, w2_flat)
    return out_flat.reshape(N, 1, H, W)


def spatial_attention_reference(x, w1, w2):
    """Pure-JAX reference matching the PyTorch forward."""
    avg = jnp.mean(x, axis=1, keepdims=True)
    mx = jnp.max(x, axis=1, keepdims=True)
    f = jnp.concatenate([avg, mx], axis=1)
    dn = ("NCHW", "OIHW", "NCHW")
    y = jax.lax.conv_general_dilated(f, w1, (1, 1), "SAME",
                                     dimension_numbers=dn,
                                     precision=jax.lax.Precision.HIGHEST)
    y = jax.lax.conv_general_dilated(y, w2, (1, 1), "SAME",
                                     dimension_numbers=dn,
                                     precision=jax.lax.Precision.HIGHEST)
    return jax.nn.sigmoid(y)


if __name__ == "__main__":
    # Small deterministic setup: batch=2, channels=4, spatial=16x16.
    N, C, H, W = 2, 4, 16, 16
    key = jax.random.PRNGKey(0)
    kx, k1, k2 = jax.random.split(key, 3)

    x = jax.random.normal(kx, (N, C, H, W), dtype=jnp.float32)

    # nn.Conv2d(2, 2, 3, padding=1, bias=False) / nn.Conv2d(2, 1, 3, padding=1,
    # bias=False): weights in OIHW, deterministic kaiming-uniform-like init.
    fan_in = 2 * 3 * 3
    bound = 1.0 / (fan_in ** 0.5)
    w1 = jax.random.uniform(k1, (2, 2, 3, 3), dtype=jnp.float32,
                            minval=-bound, maxval=bound)
    w2 = jax.random.uniform(k2, (1, 2, 3, 3), dtype=jnp.float32,
                            minval=-bound, maxval=bound)

    out = spatial_attention_pallas(x, w1, w2)
    jax.block_until_ready(out)

    ref = spatial_attention_reference(x, w1, w2)
    assert out.shape == (N, 1, H, W)
    assert jnp.allclose(out, ref, atol=5e-4, rtol=5e-4), "mismatch vs reference"

    print("KERNEL_OK")
</pallas_src>

<mosaic_0001>
module attributes {stable_mosaic.version = 11 : i64} {
  func.func @_spatial_attention_kernel(%arg0: i32, %arg1: memref<2x4x256xf32, #tpu.memory_space<vmem>>, %arg2: memref<36xf32, #tpu.memory_space<smem>>, %arg3: memref<18xf32, #tpu.memory_space<smem>>, %arg4: memref<2x1x256xf32, #tpu.memory_space<vmem>>) attributes {dimension_semantics = [#tpu.dimension_semantics<parallel>], iteration_bounds = array<i64: 1>, scalar_prefetch = 0 : i64, scratch_operands = 0 : i64, tpu.core_type = #tpu.core_type<tc>, window_params = [{transform_indices = @transform_0, window_bounds = array<i64: 2, 4, 256>}, {transform_indices = @transform_1, window_bounds = array<i64: 36>}, {transform_indices = @transform_2, window_bounds = array<i64: 18>}, {transform_indices = @transform_3, window_bounds = array<i64: 2, 1, 256>}]} {
    %c0 = arith.constant 0 : index
    %c0_0 = arith.constant 0 : index
    %c0_1 = arith.constant 0 : index
    %0 = vector.load %arg1[%c0, %c0_0, %c0_1] : memref<2x4x256xf32, #tpu.memory_space<vmem>>, vector<2x1x256xf32>
    %1 = vector.shape_cast %0 : vector<2x1x256xf32> to vector<2x256xf32>
    %c0_2 = arith.constant 0 : index
    %c1 = arith.constant 1 : index
    %c0_3 = arith.constant 0 : index
    %2 = vector.load %arg1[%c0_2, %c1, %c0_3] : memref<2x4x256xf32, #tpu.memory_space<vmem>>, vector<2x1x256xf32>
    %3 = vector.shape_cast %2 : vector<2x1x256xf32> to vector<2x256xf32>
    %4 = arith.addf %1, %3 : vector<2x256xf32>
    %5 = arith.maximumf %1, %3 : vector<2x256xf32>
    %c0_4 = arith.constant 0 : index
    %c2 = arith.constant 2 : index
    %c0_5 = arith.constant 0 : index
    %6 = vector.load %arg1[%c0_4, %c2, %c0_5] : memref<2x4x256xf32, #tpu.memory_space<vmem>>, vector<2x1x256xf32>
    %7 = vector.shape_cast %6 : vector<2x1x256xf32> to vector<2x256xf32>
    %8 = arith.addf %4, %7 : vector<2x256xf32>
    %9 = arith.maximumf %5, %7 : vector<2x256xf32>
    %c0_6 = arith.constant 0 : index
    %c3 = arith.constant 3 : index
    %c0_7 = arith.constant 0 : index
    %10 = vector.load %arg1[%c0_6, %c3, %c0_7] : memref<2x4x256xf32, #tpu.memory_space<vmem>>, vector<2x1x256xf32>
    %11 = vector.shape_cast %10 : vector<2x1x256xf32> to vector<2x256xf32>
    %12 = arith.addf %8, %11 : vector<2x256xf32>
    %13 = arith.maximumf %9, %11 : vector<2x256xf32>
    %cst = arith.constant 2.500000e-01 : f32
    %14 = vector.broadcast %cst : f32 to vector<2x256xf32>
    %15 = arith.mulf %12, %14 : vector<2x256xf32>
    %16 = tpu.iota {dimensions = array<i32: 1>} : vector<2x256xi32>
    %c16_i32 = arith.constant 16 : i32
    %c0_i32 = arith.constant 0 : i32
    %17 = arith.cmpi eq, %c16_i32, %c0_i32 : i32
    %c1_i32 = arith.constant 1 : i32
    %18 = arith.select %17, %c1_i32, %c16_i32 : i32
    %19 = vector.broadcast %18 : i32 to vector<2x256xi32>
    %20 = arith.remsi %16, %19 : vector<2x256xi32>
    %c0_i32_8 = arith.constant 0 : i32
    %21 = vector.broadcast %c0_i32_8 : i32 to vector<2x256xi32>
    %22 = arith.cmpi ne, %20, %21 : vector<2x256xi32>
    %c0_i32_9 = arith.constant 0 : i32
    %23 = vector.broadcast %c0_i32_9 : i32 to vector<2x256xi32>
    %24 = arith.cmpi slt, %20, %23 : vector<2x256xi32>
    %c0_i32_10 = arith.constant 0 : i32
    %25 = arith.cmpi slt, %18, %c0_i32_10 : i32
    %26 = vector.broadcast %25 : i1 to vector<2x256xi1>
    %27 = vector.broadcast %26 : vector<2x256xi1> to vector<2x256xi1>
    %28 = arith.xori %24, %27 : vector<2x256xi1>
    %29 = arith.andi %28, %22 : vector<2x256xi1>
    %30 = vector.broadcast %18 : i32 to vector<2x256xi32>
    %31 = arith.addi %20, %30 : vector<2x256xi32>
    %32 = arith.select %29, %31, %20 : vector<2x256xi1>, vector<2x256xi32>
    %c15_i32 = arith.constant 15 : i32
    %33 = vector.broadcast %c15_i32 : i32 to vector<2x256xi32>
    %34 = arith.cmpi ne, %32, %33 : vector<2x256xi32>
    %c0_i32_11 = arith.constant 0 : i32
    %35 = vector.broadcast %c0_i32_11 : i32 to vector<2x256xi32>
    %36 = arith.cmpi ne, %32, %35 : vector<2x256xi32>
    %c240_i32 = arith.constant 240 : i32
    %37 = vector.broadcast %c240_i32 : i32 to vector<2x256xi32>
    %38 = arith.cmpi slt, %16, %37 : vector<2x256xi32>
    %c16_i32_12 = arith.constant 16 : i32
    %39 = vector.broadcast %c16_i32_12 : i32 to vector<2x256xi32>
    %40 = arith.cmpi sge, %16, %39 : vector<2x256xi32>
    %c1_i32_13 = arith.constant 1 : i32
    %41 = tpu.dynamic_rotate %15 by %c1_i32_13 dim 1 : vector<2x256xf32>, i32 -> vector<2x256xf32>
    %cst_14 = arith.constant 0.000000e+00 : f32
    %42 = vector.broadcast %cst_14 : f32 to vector<2x256xf32>
    %43 = arith.select %36, %41, %42 : vector<2x256xi1>, vector<2x256xf32>
    %c255_i32 = arith.constant 255 : i32
    %44 = tpu.dynamic_rotate %15 by %c255_i32 dim 1 : vector<2x256xf32>, i32 -> vector<2x256xf32>
    %cst_15 = arith.constant 0.000000e+00 : f32
    %45 = vector.broadcast %cst_15 : f32 to vector<2x256xf32>
    %46 = arith.select %34, %44, %45 : vector<2x256xi1>, vector<2x256xf32>
    %c1_i32_16 = arith.constant 1 : i32
    %47 = tpu.dynamic_rotate %13 by %c1_i32_16 dim 1 : vector<2x256xf32>, i32 -> vector<2x256xf32>
    %cst_17 = arith.constant 0.000000e+00 : f32
    %48 = vector.broadcast %cst_17 : f32 to vector<2x256xf32>
    %49 = arith.select %36, %47, %48 : vector<2x256xi1>, vector<2x256xf32>
    %c255_i32_18 = arith.constant 255 : i32
    %50 = tpu.dynamic_rotate %13 by %c255_i32_18 dim 1 : vector<2x256xf32>, i32 -> vector<2x256xf32>
    %cst_19 = arith.constant 0.000000e+00 : f32
    %51 = vector.broadcast %cst_19 : f32 to vector<2x256xf32>
    %52 = arith.select %34, %50, %51 : vector<2x256xi1>, vector<2x256xf32>
    %c0_20 = arith.constant 0 : index
    %53 = memref.load %arg2[%c0_20] : memref<36xf32, #tpu.memory_space<smem>>
    %54 = vector.broadcast %53 : f32 to vector<2x256xf32>
    %55 = arith.mulf %54, %43 : vector<2x256xf32>
    %c1_21 = arith.constant 1 : index
    %56 = memref.load %arg2[%c1_21] : memref<36xf32, #tpu.memory_space<smem>>
    %57 = vector.broadcast %56 : f32 to vector<2x256xf32>
    %58 = arith.mulf %57, %15 : vector<2x256xf32>
    %59 = arith.addf %55, %58 : vector<2x256xf32>
    %c2_22 = arith.constant 2 : index
    %60 = memref.load %arg2[%c2_22] : memref<36xf32, #tpu.memory_space<smem>>
    %61 = vector.broadcast %60 : f32 to vector<2x256xf32>
    %62 = arith.mulf %61, %46 : vector<2x256xf32>
    %63 = arith.addf %59, %62 : vector<2x256xf32>
    %c9 = arith.constant 9 : index
    %64 = memref.load %arg2[%c9] : memref<36xf32, #tpu.memory_space<smem>>
    %65 = vector.broadcast %64 : f32 to vector<2x256xf32>
    %66 = arith.mulf %65, %49 : vector<2x256xf32>
    %67 = arith.addf %63, %66 : vector<2x256xf32>
    %c10 = arith.constant 10 : index
    %68 = memref.load %arg2[%c10] : memref<36xf32, #tpu.memory_space<smem>>
    %69 = vector.broadcast %68 : f32 to vector<2x256xf32>
    %70 = arith.mulf %69, %13 : vector<2x256xf32>
    %71 = arith.addf %67, %70 : vector<2x256xf32>
    %c11 = arith.constant 11 : index
    %72 = memref.load %arg2[%c11] : memref<36xf32, #tpu.memory_space<smem>>
    %73 = vector.broadcast %72 : f32 to vector<2x256xf32>
    %74 = arith.mulf %73, %52 : vector<2x256xf32>
    %75 = arith.addf %71, %74 : vector<2x256xf32>
    %c16_i32_23 = arith.constant 16 : i32
    %76 = tpu.dynamic_rotate %75 by %c16_i32_23 dim 1 : vector<2x256xf32>, i32 -> vector<2x256xf32>
    %cst_24 = arith.constant 0.000000e+00 : f32
    %77 = vector.broadcast %cst_24 : f32 to vector<2x256xf32>
    %78 = arith.select %40, %76, %77 : vector<2x256xi1>, vector<2x256xf32>
    %c3_25 = arith.constant 3 : index
    %79 = memref.load %arg2[%c3_25] : memref<36xf32, #tpu.memory_space<smem>>
    %80 = vector.broadcast %79 : f32 to vector<2x256xf32>
    %81 = arith.mulf %80, %43 : vector<2x256xf32>
    %c4 = arith.constant 4 : index
    %82 = memref.load %arg2[%c4] : memref<36xf32, #tpu.memory_space<smem>>
    %83 = vector.broadcast %82 : f32 to vector<2x256xf32>
    %84 = arith.mulf %83, %15 : vector<2x256xf32>
    %85 = arith.addf %81, %84 : vector<2x256xf32>
    %c5 = arith.constant 5 : index
    %86 = memref.load %arg2[%c5] : memref<36xf32, #tpu.memory_space<smem>>
    %87 = vector.broadcast %86 : f32 to vector<2x256xf32>
    %88 = arith.mulf %87, %46 : vector<2x256xf32>
    %89 = arith.addf %85, %88 : vector<2x256xf32>
    %c12 = arith.constant 12 : index
    %90 = memref.load %arg2[%c12] : memref<36xf32, #tpu.memory_space<smem>>
    %91 = vector.broadcast %90 : f32 to vector<2x256xf32>
    %92 = arith.mulf %91, %49 : vector<2x256xf32>
    %93 = arith.addf %89, %92 : vector<2x256xf32>
    %c13 = arith.constant 13 : index
    %94 = memref.load %arg2[%c13] : memref<36xf32, #tpu.memory_space<smem>>
    %95 = vector.broadcast %94 : f32 to vector<2x256xf32>
    %96 = arith.mulf %95, %13 : vector<2x256xf32>
    %97 = arith.addf %93, %96 : vector<2x256xf32>
    %c14 = arith.constant 14 : index
    %98 = memref.load %arg2[%c14] : memref<36xf32, #tpu.memory_space<smem>>
    %99 = vector.broadcast %98 : f32 to vector<2x256xf32>
    %100 = arith.mulf %99, %52 : vector<2x256xf32>
    %101 = arith.addf %97, %100 : vector<2x256xf32>
    %102 = arith.addf %78, %101 : vector<2x256xf32>
    %c6 = arith.constant 6 : index
    %103 = memref.load %arg2[%c6] : memref<36xf32, #tpu.memory_space<smem>>
    %104 = vector.broadcast %103 : f32 to vector<2x256xf32>
    %105 = arith.mulf %104, %43 : vector<2x256xf32>
    %c7 = arith.constant 7 : index
    %106 = memref.load %arg2[%c7] : memref<36xf32, #tpu.memory_space<smem>>
    %107 = vector.broadcast %106 : f32 to vector<2x256xf32>
    %108 = arith.mulf %107, %15 : vector<2x256xf32>
    %109 = arith.addf %105, %108 : vector<2x256xf32>
    %c8 = arith.constant 8 : index
    %110 = memref.load %arg2[%c8] : memref<36xf32, #tpu.memory_space<smem>>
    %111 = vector.broadcast %110 : f32 to vector<2x256xf32>
    %112 = arith.mulf %111, %46 : vector<2x256xf32>
    %113 = arith.addf %109, %112 : vector<2x256xf32>
    %c15 = arith.constant 15 : index
    %114 = memref.load %arg2[%c15] : memref<36xf32, #tpu.memory_space<smem>>
    %115 = vector.broadcast %114 : f32 to vector<2x256xf32>
    %116 = arith.mulf %115, %49 : vector<2x256xf32>
    %117 = arith.addf %113, %116 : vector<2x256xf32>
    %c16 = arith.constant 16 : index
    %118 = memref.load %arg2[%c16] : memref<36xf32, #tpu.memory_space<smem>>
    %119 = vector.broadcast %118 : f32 to vector<2x256xf32>
    %120 = arith.mulf %119, %13 : vector<2x256xf32>
    %121 = arith.addf %117, %120 : vector<2x256xf32>
    %c17 = arith.constant 17 : index
    %122 = memref.load %arg2[%c17] : memref<36xf32, #tpu.memory_space<smem>>
    %123 = vector.broadcast %122 : f32 to vector<2x256xf32>
    %124 = arith.mulf %123, %52 : vector<2x256xf32>
    %125 = arith.addf %121, %124 : vector<2x256xf32>
    %c240_i32_26 = arith.constant 240 : i32
    %126 = tpu.dynamic_rotate %125 by %c240_i32_26 dim 1 : vector<2x256xf32>, i32 -> vector<2x256xf32>
    %cst_27 = arith.constant 0.000000e+00 : f32
    %127 = vector.broadcast %cst_27 : f32 to vector<2x256xf32>
    %128 = arith.select %38, %126, %127 : vector<2x256xi1>, vector<2x256xf32>
    %129 = arith.addf %102, %128 : vector<2x256xf32>
    %c18 = arith.constant 18 : index
    %130 = memref.load %arg2[%c18] : memref<36xf32, #tpu.memory_space<smem>>
    %131 = vector.broadcast %130 : f32 to vector<2x256xf32>
    %132 = arith.mulf %131, %43 : vector<2x256xf32>
    %c19 = arith.constant 19 : index
    %133 = memref.load %arg2[%c19] : memref<36xf32, #tpu.memory_space<smem>>
    %134 = vector.broadcast %133 : f32 to vector<2x256xf32>
    %135 = arith.mulf %134, %15 : vector<2x256xf32>
    %136 = arith.addf %132, %135 : vector<2x256xf32>
    %c20 = arith.constant 20 : index
    %137 = memref.load %arg2[%c20] : memref<36xf32, #tpu.memory_space<smem>>
    %138 = vector.broadcast %137 : f32 to vector<2x256xf32>
    %139 = arith.mulf %138, %46 : vector<2x256xf32>
    %140 = arith.addf %136, %139 : vector<2x256xf32>
    %c27 = arith.constant 27 : index
    %141 = memref.load %arg2[%c27] : memref<36xf32, #tpu.memory_space<smem>>
    %142 = vector.broadcast %141 : f32 to vector<2x256xf32>
    %143 = arith.mulf %142, %49 : vector<2x256xf32>
    %144 = arith.addf %140, %143 : vector<2x256xf32>
    %c28 = arith.constant 28 : index
    %145 = memref.load %arg2[%c28] : memref<36xf32, #tpu.memory_space<smem>>
    %146 = vector.broadcast %145 : f32 to vector<2x256xf32>
    %147 = arith.mulf %146, %13 : vector<2x256xf32>
    %148 = arith.addf %144, %147 : vector<2x256xf32>
    %c29 = arith.constant 29 : index
    %149 = memref.load %arg2[%c29] : memref<36xf32, #tpu.memory_space<smem>>
    %150 = vector.broadcast %149 : f32 to vector<2x256xf32>
    %151 = arith.mulf %150, %52 : vector<2x256xf32>
    %152 = arith.addf %148, %151 : vector<2x256xf32>
    %c16_i32_28 = arith.constant 16 : i32
    %153 = tpu.dynamic_rotate %152 by %c16_i32_28 dim 1 : vector<2x256xf32>, i32 -> vector<2x256xf32>
    %cst_29 = arith.constant 0.000000e+00 : f32
    %154 = vector.broadcast %cst_29 : f32 to vector<2x256xf32>
    %155 = arith.select %40, %153, %154 : vector<2x256xi1>, vector<2x256xf32>
    %c21 = arith.constant 21 : index
    %156 = memref.load %arg2[%c21] : memref<36xf32, #tpu.memory_space<smem>>
    %157 = vector.broadcast %156 : f32 to vector<2x256xf32>
    %158 = arith.mulf %157, %43 : vector<2x256xf32>
    %c22 = arith.constant 22 : index
    %159 = memref.load %arg2[%c22] : memref<36xf32, #tpu.memory_space<smem>>
    %160 = vector.broadcast %159 : f32 to vector<2x256xf32>
    %161 = arith.mulf %160, %15 : vector<2x256xf32>
    %162 = arith.addf %158, %161 : vector<2x256xf32>
    %c23 = arith.constant 23 : index
    %163 = memref.load %arg2[%c23] : memref<36xf32, #tpu.memory_space<smem>>
    %164 = vector.broadcast %163 : f32 to vector<2x256xf32>
    %165 = arith.mulf %164, %46 : vector<2x256xf32>
    %166 = arith.addf %162, %165 : vector<2x256xf32>
    %c30 = arith.constant 30 : index
    %167 = memref.load %arg2[%c30] : memref<36xf32, #tpu.memory_space<smem>>
    %168 = vector.broadcast %167 : f32 to vector<2x256xf32>
    %169 = arith.mulf %168, %49 : vector<2x256xf32>
    %170 = arith.addf %166, %169 : vector<2x256xf32>
    %c31 = arith.constant 31 : index
    %171 = memref.load %arg2[%c31] : memref<36xf32, #tpu.memory_space<smem>>
    %172 = vector.broadcast %171 : f32 to vector<2x256xf32>
    %173 = arith.mulf %172, %13 : vector<2x256xf32>
    %174 = arith.addf %170, %173 : vector<2x256xf32>
    %c32 = arith.constant 32 : index
    %175 = memref.load %arg2[%c32] : memref<36xf32, #tpu.memory_space<smem>>
    %176 = vector.broadcast %175 : f32 to vector<2x256xf32>
    %177 = arith.mulf %176, %52 : vector<2x256xf32>
    %178 = arith.addf %174, %177 : vector<2x256xf32>
    %179 = arith.addf %155, %178 : vector<2x256xf32>
    %c24 = arith.constant 24 : index
    %180 = memref.load %arg2[%c24] : memref<36xf32, #tpu.memory_space<smem>>
    %181 = vector.broadcast %180 : f32 to vector<2x256xf32>
    %182 = arith.mulf %181, %43 : vector<2x256xf32>
    %c25 = arith.constant 25 : index
    %183 = memref.load %arg2[%c25] : memref<36xf32, #tpu.memory_space<smem>>
    %184 = vector.broadcast %183 : f32 to vector<2x256xf32>
    %185 = arith.mulf %184, %15 : vector<2x256xf32>
    %186 = arith.addf %182, %185 : vector<2x256xf32>
    %c26 = arith.constant 26 : index
    %187 = memref.load %arg2[%c26] : memref<36xf32, #tpu.memory_space<smem>>
    %188 = vector.broadcast %187 : f32 to vector<2x256xf32>
    %189 = arith.mulf %188, %46 : vector<2x256xf32>
    %190 = arith.addf %186, %189 : vector<2x256xf32>
    %c33 = arith.constant 33 : index
    %191 = memref.load %arg2[%c33] : memref<36xf32, #tpu.memory_space<smem>>
    %192 = vector.broadcast %191 : f32 to vector<2x256xf32>
    %193 = arith.mulf %192, %49 : vector<2x256xf32>
    %194 = arith.addf %190, %193 : vector<2x256xf32>
    %c34 = arith.constant 34 : index
    %195 = memref.load %arg2[%c34] : memref<36xf32, #tpu.memory_space<smem>>
    %196 = vector.broadcast %195 : f32 to vector<2x256xf32>
    %197 = arith.mulf %196, %13 : vector<2x256xf32>
    %198 = arith.addf %194, %197 : vector<2x256xf32>
    %c35 = arith.constant 35 : index
    %199 = memref.load %arg2[%c35] : memref<36xf32, #tpu.memory_space<smem>>
    %200 = vector.broadcast %199 : f32 to vector<2x256xf32>
    %201 = arith.mulf %200, %52 : vector<2x256xf32>
    %202 = arith.addf %198, %201 : vector<2x256xf32>
    %c240_i32_30 = arith.constant 240 : i32
    %203 = tpu.dynamic_rotate %202 by %c240_i32_30 dim 1 : vector<2x256xf32>, i32 -> vector<2x256xf32>
    %cst_31 = arith.constant 0.000000e+00 : f32
    %204 = vector.broadcast %cst_31 : f32 to vector<2x256xf32>
    %205 = arith.select %38, %203, %204 : vector<2x256xi1>, vector<2x256xf32>
    %206 = arith.addf %179, %205 : vector<2x256xf32>
    %c1_i32_32 = arith.constant 1 : i32
    %207 = tpu.dynamic_rotate %129 by %c1_i32_32 dim 1 : vector<2x256xf32>, i32 -> vector<2x256xf32>
    %cst_33 = arith.constant 0.000000e+00 : f32
    %208 = vector.broadcast %cst_33 : f32 to vector<2x256xf32>
    %209 = arith.select %36, %207, %208 : vector<2x256xi1>, vector<2x256xf32>
    %c255_i32_34 = arith.constant 255 : i32
    %210 = tpu.dynamic_rotate %129 by %c255_i32_34 dim 1 : vector<2x256xf32>, i32 -> vector<2x256xf32>
    %cst_35 = arith.constant 0.000000e+00 : f32
    %211 = vector.broadcast %cst_35 : f32 to vector<2x256xf32>
    %212 = arith.select %34, %210, %211 : vector<2x256xi1>, vector<2x256xf32>
    %c1_i32_36 = arith.constant 1 : i32
    %213 = tpu.dynamic_rotate %206 by %c1_i32_36 dim 1 : vector<2x256xf32>, i32 -> vector<2x256xf32>
    %cst_37 = arith.constant 0.000000e+00 : f32
    %214 = vector.broadcast %cst_37 : f32 to vector<2x256xf32>
    %215 = arith.select %36, %213, %214 : vector<2x256xi1>, vector<2x256xf32>
    %c255_i32_38 = arith.constant 255 : i32
    %216 = tpu.dynamic_rotate %206 by %c255_i32_38 dim 1 : vector<2x256xf32>, i32 -> vector<2x256xf32>
    %cst_39 = arith.constant 0.000000e+00 : f32
    %217 = vector.broadcast %cst_39 : f32 to vector<2x256xf32>
    %218 = arith.select %34, %216, %217 : vector<2x256xi1>, vector<2x256xf32>
    %c0_40 = arith.constant 0 : index
    %219 = memref.load %arg3[%c0_40] : memref<18xf32, #tpu.memory_space<smem>>
    %220 = vector.broadcast %219 : f32 to vector<2x256xf32>
    %221 = arith.mulf %220, %209 : vector<2x256xf32>
    %c1_41 = arith.constant 1 : index
    %222 = memref.load %arg3[%c1_41] : memref<18xf32, #tpu.memory_space<smem>>
    %223 = vector.broadcast %222 : f32 to vector<2x256xf32>
    %224 = arith.mulf %223, %129 : vector<2x256xf32>
    %225 = arith.addf %221, %224 : vector<2x256xf32>
    %c2_42 = arith.constant 2 : index
    %226 = memref.load %arg3[%c2_42] : memref<18xf32, #tpu.memory_space<smem>>
    %227 = vector.broadcast %226 : f32 to vector<2x256xf32>
    %228 = arith.mulf %227, %212 : vector<2x256xf32>
    %229 = arith.addf %225, %228 : vector<2x256xf32>
    %c9_43 = arith.constant 9 : index
    %230 = memref.load %arg3[%c9_43] : memref<18xf32, #tpu.memory_space<smem>>
    %231 = vector.broadcast %230 : f32 to vector<2x256xf32>
    %232 = arith.mulf %231, %215 : vector<2x256xf32>
    %233 = arith.addf %229, %232 : vector<2x256xf32>
    %c10_44 = arith.constant 10 : index
    %234 = memref.load %arg3[%c10_44] : memref<18xf32, #tpu.memory_space<smem>>
    %235 = vector.broadcast %234 : f32 to vector<2x256xf32>
    %236 = arith.mulf %235, %206 : vector<2x256xf32>
    %237 = arith.addf %233, %236 : vector<2x256xf32>
    %c11_45 = arith.constant 11 : index
    %238 = memref.load %arg3[%c11_45] : memref<18xf32, #tpu.memory_space<smem>>
    %239 = vector.broadcast %238 : f32 to vector<2x256xf32>
    %240 = arith.mulf %239, %218 : vector<2x256xf32>
    %241 = arith.addf %237, %240 : vector<2x256xf32>
    %c16_i32_46 = arith.constant 16 : i32
    %242 = tpu.dynamic_rotate %241 by %c16_i32_46 dim 1 : vector<2x256xf32>, i32 -> vector<2x256xf32>
    %cst_47 = arith.constant 0.000000e+00 : f32
    %243 = vector.broadcast %cst_47 : f32 to vector<2x256xf32>
    %244 = arith.select %40, %242, %243 : vector<2x256xi1>, vector<2x256xf32>
    %c3_48 = arith.constant 3 : index
    %245 = memref.load %arg3[%c3_48] : memref<18xf32, #tpu.memory_space<smem>>
    %246 = vector.broadcast %245 : f32 to vector<2x256xf32>
    %247 = arith.mulf %246, %209 : vector<2x256xf32>
    %c4_49 = arith.constant 4 : index
    %248 = memref.load %arg3[%c4_49] : memref<18xf32, #tpu.memory_space<smem>>
    %249 = vector.broadcast %248 : f32 to vector<2x256xf32>
    %250 = arith.mulf %249, %129 : vector<2x256xf32>
    %251 = arith.addf %247, %250 : vector<2x256xf32>
    %c5_50 = arith.constant 5 : index
    %252 = memref.load %arg3[%c5_50] : memref<18xf32, #tpu.memory_space<smem>>
    %253 = vector.broadcast %252 : f32 to vector<2x256xf32>
    %254 = arith.mulf %253, %212 : vector<2x256xf32>
    %255 = arith.addf %251, %254 : vector<2x256xf32>
    %c12_51 = arith.constant 12 : index
    %256 = memref.load %arg3[%c12_51] : memref<18xf32, #tpu.memory_space<smem>>
    %257 = vector.broadcast %256 : f32 to vector<2x256xf32>
    %258 = arith.mulf %257, %215 : vector<2x256xf32>
    %259 = arith.addf %255, %258 : vector<2x256xf32>
    %c13_52 = arith.constant 13 : index
    %260 = memref.load %arg3[%c13_52] : memref<18xf32, #tpu.memory_space<smem>>
    %261 = vector.broadcast %260 : f32 to vector<2x256xf32>
    %262 = arith.mulf %261, %206 : vector<2x256xf32>
    %263 = arith.addf %259, %262 : vector<2x256xf32>
    %c14_53 = arith.constant 14 : index
    %264 = memref.load %arg3[%c14_53] : memref<18xf32, #tpu.memory_space<smem>>
    %265 = vector.broadcast %264 : f32 to vector<2x256xf32>
    %266 = arith.mulf %265, %218 : vector<2x256xf32>
    %267 = arith.addf %263, %266 : vector<2x256xf32>
    %268 = arith.addf %244, %267 : vector<2x256xf32>
    %c6_54 = arith.constant 6 : index
    %269 = memref.load %arg3[%c6_54] : memref<18xf32, #tpu.memory_space<smem>>
    %270 = vector.broadcast %269 : f32 to vector<2x256xf32>
    %271 = arith.mulf %270, %209 : vector<2x256xf32>
    %c7_55 = arith.constant 7 : index
    %272 = memref.load %arg3[%c7_55] : memref<18xf32, #tpu.memory_space<smem>>
    %273 = vector.broadcast %272 : f32 to vector<2x256xf32>
    %274 = arith.mulf %273, %129 : vector<2x256xf32>
    %275 = arith.addf %271, %274 : vector<2x256xf32>
    %c8_56 = arith.constant 8 : index
    %276 = memref.load %arg3[%c8_56] : memref<18xf32, #tpu.memory_space<smem>>
    %277 = vector.broadcast %276 : f32 to vector<2x256xf32>
    %278 = arith.mulf %277, %212 : vector<2x256xf32>
    %279 = arith.addf %275, %278 : vector<2x256xf32>
    %c15_57 = arith.constant 15 : index
    %280 = memref.load %arg3[%c15_57] : memref<18xf32, #tpu.memory_space<smem>>
    %281 = vector.broadcast %280 : f32 to vector<2x256xf32>
    %282 = arith.mulf %281, %215 : vector<2x256xf32>
    %283 = arith.addf %279, %282 : vector<2x256xf32>
    %c16_58 = arith.constant 16 : index
    %284 = memref.load %arg3[%c16_58] : memref<18xf32, #tpu.memory_space<smem>>
    %285 = vector.broadcast %284 : f32 to vector<2x256xf32>
    %286 = arith.mulf %285, %206 : vector<2x256xf32>
    %287 = arith.addf %283, %286 : vector<2x256xf32>
    %c17_59 = arith.constant 17 : index
    %288 = memref.load %arg3[%c17_59] : memref<18xf32, #tpu.memory_space<smem>>
    %289 = vector.broadcast %288 : f32 to vector<2x256xf32>
    %290 = arith.mulf %289, %218 : vector<2x256xf32>
    %291 = arith.addf %287, %290 : vector<2x256xf32>
    %c240_i32_60 = arith.constant 240 : i32
    %292 = tpu.dynamic_rotate %291 by %c240_i32_60 dim 1 : vector<2x256xf32>, i32 -> vector<2x256xf32>
    %cst_61 = arith.constant 0.000000e+00 : f32
    %293 = vector.broadcast %cst_61 : f32 to vector<2x256xf32>
    %294 = arith.select %38, %292, %293 : vector<2x256xi1>, vector<2x256xf32>
    %295 = arith.addf %268, %294 : vector<2x256xf32>
    %cst_62 = arith.constant 0.000000e+00 : f32
    %296 = vector.broadcast %cst_62 : f32 to vector<2x256xf32>
    %297 = arith.subf %296, %295 : vector<2x256xf32>
    %298 = math.exp %297 : vector<2x256xf32>
    %cst_63 = arith.constant 1.000000e+00 : f32
    %299 = vector.broadcast %cst_63 : f32 to vector<2x256xf32>
    %300 = arith.addf %299, %298 : vector<2x256xf32>
    %cst_64 = arith.constant 1.000000e+00 : f32
    %301 = vector.broadcast %cst_64 : f32 to vector<2x256xf32>
    %302 = arith.divf %301, %300 : vector<2x256xf32>
    %c0_65 = arith.constant 0 : index
    %c0_66 = arith.constant 0 : index
    %c0_67 = arith.constant 0 : index
    %303 = vector.load %arg4[%c0_65, %c0_66, %c0_67] : memref<2x1x256xf32, #tpu.memory_space<vmem>>, vector<2x1x256xf32>
    %304 = vector.shape_cast %303 : vector<2x1x256xf32> to vector<2x256xf32>
    %305 = vector.shape_cast %302 : vector<2x256xf32> to vector<2x1x256xf32>
    tpu.vector_store %arg4[%c0_65, %c0_66, %c0_67], %305 {strides = array<i32>} : memref<2x1x256xf32, #tpu.memory_space<vmem>>, vector<2x1x256xf32>,
    return
  }
  func.func @transform_0(%arg0: i32) -> (i32, i32, i32) {
    %c0_i32 = arith.constant 0 : i32
    %c0_i32_0 = arith.constant 0 : i32
    %c0_i32_1 = arith.constant 0 : i32
    return %arg0, %c0_i32, %c0_i32_0 : i32, i32, i32
  }
  func.func @transform_1(%arg0: i32) -> i32 {
    %c0_i32 = arith.constant 0 : i32
    %c0_i32_0 = arith.constant 0 : i32
    return %c0_i32 : i32
  }
  func.func @transform_2(%arg0: i32) -> i32 {
    %c0_i32 = arith.constant 0 : i32
    %c0_i32_0 = arith.constant 0 : i32
    return %c0_i32 : i32
  }
  func.func @transform_3(%arg0: i32) -> (i32, i32, i32) {
    %c0_i32 = arith.constant 0 : i32
    %c0_i32_0 = arith.constant 0 : i32
    %c0_i32_1 = arith.constant 0 : i32
    return %arg0, %c0_i32, %c0_i32_0 : i32, i32, i32
  }
}

</mosaic_0001>

<bundles_post_ra>
// kernel: tpu_custom_call.1
= control target key start
LH: loop header
LB: loop body
LE: loop exit
PB: predicated region body
PF: predicated region fallthrough
CT: control target
= control target key end

     0   :  { %8 = vsyncpa [#allocation3], 0  ;;  %s2005_s0 = inlined_call_operand.hbm [shape: f32[2,4,256], index: 0, kind: input, shape index: {}]   ;;  %s2006_s1 = inlined_call_operand.vmem [shape: f32[36], index: 1, kind: input, shape index: {}]   ;;  %s2007_s2 = inlined_call_operand.vmem [shape: f32[18], index: 2, kind: input, shape index: {}]   ;;  %s2008_s3 = inlined_call_operand.hbm [shape: f32[2,1,256], index: 3, kind: output, shape index: {}]  }
   0x1   :  { %9 = vsyncpa [#allocation5], 0 }
   0x2   :  { %10 = vsyncpa [#allocation8], 0 }
   0x3   :  { %11 = vsyncpa [#allocation4], 0  ;;  %s1143_s12 = smov [#allocation2]   ;;  %s30_s16 = sshll.u32 %s2006_s1, 4  ;;  %s31_s16 = int_to_ptr.vmem [resolvable:$true] %s30_s16 }
   0x4   :  { %s17_s13 = sshll.u32 %s1143_s12, 4  ;;  %s1067_s19 = scalar_lea.hbm %s2005_s0, 256  ;;  %s18_s13 = int_to_ptr.vmem [resolvable:$true] %s17_s13 }
   0x5   :  { %p1068_p0 = scmp.ne.s32.totalorder %s2005_s0, %s1067_s19  ;;  %p1071_p1 = scmp.lt.u32.totalorder %s1067_s19, %s2005_s0 }
   0x7   :  { %p1073_p2 = pnand %p1071_p1, %p1068_p0 }
   0x9   :  { %1076 = shalt.err (!%p1073_p2)
}
   0xa   :  { %s1077_s24 = scalar_lea.vmem %s18_s13, 256  ;;  %p1082_p4 = scmp.lt.s32.totalorder %s18_s13, %s18_s13 }
   0xb   :  { %p1078_p3 = scmp.ne.s32.totalorder %s18_s13, %s1077_s24  ;;  %p1083_p5 = scmp.lt.s32.totalorder %s1077_s24, %s1077_s24 }
   0xd   :  { %p1084_p6 = por %p1083_p5, %p1082_p4 }
   0xf   :  { %p1085_p7 = pnand %p1084_p6, %p1078_p3 }
  0x11   :  { %1088 = shalt.err (!%p1085_p7)
}
  0x12   :  { %s1144_s1 = smov 128   ;;  %s1145_s25 = smov 8  }
  0x13   :  { %23 = dma.hbm_to_vmem [thread:$0]  %s2005_s0, 256, %s18_s13, [#allocation3], %s1144_s1, %s1144_s1, %s1145_s25  }
  0x14   :  { %s1089_s28 = scalar_lea.vmem %s31_s16, 16  ;;  %p1094_p9 = scmp.lt.s32.totalorder %s31_s16, %s31_s16 }
  0x15   :  { %p1090_p8 = scmp.ne.s32.totalorder %s31_s16, %s1089_s28  ;;  %p1095_p10 = scmp.lt.s32.totalorder %s1089_s28, %s1089_s28 }
  0x17   :  { %p1096_p11 = por %p1095_p10, %p1094_p9 }
  0x19   :  { %p1097_p12 = pnand %p1096_p11, %p1090_p8 }
  0x1b   :  { %1100 = shalt.err (!%p1097_p12)
}
  0x1c   :  { %s1146_s29 = smov [#allocation6]   ;;  %s40_s5 = sshll.u32 %s2007_s2, 4  ;;  %s41_s5 = int_to_ptr.vmem [resolvable:$true] %s40_s5 }
  0x1d   :  { %33 = dma.vmem_to_smem %s31_s16, 16, %s1146_s29, [#allocation5]  }
  0x1e   :  { %s1101_s6 = scalar_lea.vmem %s41_s5, 16  ;;  %p1106_p0 = scmp.lt.s32.totalorder %s41_s5, %s41_s5 }
  0x1f   :  { %p1102_p13 = scmp.ne.s32.totalorder %s41_s5, %s1101_s6  ;;  %p1107_p1 = scmp.lt.s32.totalorder %s1101_s6, %s1101_s6 }
  0x21   :  { %p1108_p2 = por %p1107_p1, %p1106_p0 }
  0x23   :  { %p1109_p3 = pnand %p1108_p2, %p1102_p13 }
  0x25   :  { %1112 = shalt.err (!%p1109_p3)
}
  0x26   :  { %s1147_s0 = smov [#allocation7]  }
  0x27   :  { %43 = dma.vmem_to_smem %s41_s5, 16, %s1147_s0, [#allocation8]  }
  0x28   :  { %1135 = dma.done.wait [#allocation3], 256  }
  0x29   :  { %1136 = vsyncadd [#allocation3], 4294967040 }
  0x2a   :  { %1137 = dma.done.wait [#allocation5], 16  }
  0x2b   :  { %1138 = vsyncadd [#allocation5], 4294967280 }
  0x2c   :  { %1139 = dma.done.wait [#allocation8], 16  }
  0x2d   :  { %1140 = vsyncadd [#allocation8], 4294967280 }
  0x2e   :  { %53 = sfence }
  0x2f   :  { %v54_v0 = vld [vmem:[#allocation2] ss:$4 sm:$0x3]  ;;  %v56_v1 = vld [vmem:[#allocation2 + $0x8] ss:$4 sm:$0x3]  ;;  %v2009_v12 = vlaneseq }
  0x30   :  { %v58_v2 = vld [vmem:[#allocation2 + $0x1] ss:$4 sm:$0x3]  ;;  %v60_v3 = vld [vmem:[#allocation2 + $0x9] ss:$4 sm:$0x3] }
  0x31   :  { %v61_v4 = vadd.f32 %v58_v2, %v54_v0  ;;  %v62_v5 = vadd.f32 %v60_v3, %v56_v1  ;;  %v63_v6 = vmax.f32 %v54_v0, %v58_v2  ;;  %v64_v7 = vmax.f32 %v56_v1, %v60_v3  ;;  %v66_v8 = vld [vmem:[#allocation2 + $0x2] ss:$4 sm:$0x3]  ;;  %v68_v9 = vld [vmem:[#allocation2 + $0xa] ss:$4 sm:$0x3] }
  0x32   :  { %v74_v10 = vld [vmem:[#allocation2 + $0x3] ss:$4 sm:$0x3]  ;;  %v76_v11 = vld [vmem:[#allocation2 + $0xb] ss:$4 sm:$0x3] }
  0x33   :  { %v69_v13 = vadd.f32 %v66_v8, %v61_v4  ;;  %v70_v14 = vadd.f32 %v68_v9, %v62_v5  ;;  %v71_v15 = vmax.f32 %v63_v6, %v66_v8  ;;  %v72_v16 = vmax.f32 %v64_v7, %v68_v9  ;;  %s994_s2 = sld [smem:[#allocation6 + $0x1]]  ;;  %s997_s7 = sld [smem:[#allocation6 + $0xa]] }
  0x34   :  { %v1148_v21 = vmov 1966171168   ;;  %v125_v23 = vshrl.u32 %v2009_v12, 7  ;;  %s1006_s8 = sld [smem:[#allocation6 + $0x7]]  ;;  %s1009_s9 = sld [smem:[#allocation6 + $0x10]] }
  0x35   :  { %v77_v17 = vadd.f32 %v74_v10, %v69_v13  ;;  %v78_v18 = vadd.f32 %v76_v11, %v70_v14  ;;  %v1194_v19 = vmax.f32 %v71_v15, %v74_v10  ;;  %v1196_v20 = vmax.f32 %v72_v16, %v76_v11  ;;  %s1212_s10 = sld [smem:[#allocation6 + $0x13]]  ;;  %s1149_s11 = smov 127  }
  0x36   :  { %v122_v22 = vunpack.c.l.s4 %v1148_v21  ;;  %s1150_s12 = smov 1   ;;  %s1015_s13 = sld [smem:[#allocation6 + $0x1c]] }
  0x37   :  { %v1199_v24 = vmul.f32 0.25, %v77_v17  ;;  %v1201_v25 = vmul.f32 0.25, %v78_v18  ;;  %v165_v27 = vcombine.low %v1194_v19, %v1196_v20  ;;  %s1024_s14 = sld [smem:[#allocation6 + $0x19]]  ;;  %s1027_s15 = sld [smem:[#allocation6 + $0x22]] }
  0x38   :  { %v123_v26 = vunpack.c.0.s8 %v122_v22  ;;  %s1000_s16 = sld [smem:[#allocation6 + $0x4]]  ;;  %s1003_s17 = sld [smem:[#allocation6 + $0xd]] }
  0x39   :  { %v120_v28 = vcombine.low %v1199_v24, %v1201_v25  ;;  %v211_v36 = vstv %s994_s2  ;;  %v256_v40 = vstv %s997_s7  ;;  %s1018_s18 = sld [smem:[#allocation6 + $0x16]]  ;;  %s1021_s19 = sld [smem:[#allocation6 + $0x1f]] }
  0x3a   :  { %v1207_v29 = vsub.s32 %v123_v26, %v125_v23  ;;  %v1219_v38 = vmul.f32 %v211_v36, %v1199_v24  ;;  %v1222_v39 = vmul.f32 %v211_v36, %v1201_v25  ;;  %v1226_v42 = vmul.f32 %v256_v40, %v1194_v19  ;;  %s1322_s20 = sld [smem:[#allocation6 + $0x2]]  ;;  %s1324_s21 = sld [smem:[#allocation6 + $0x5]] }
  0x3b   :  { %v1229_v43 = vmul.f32 %v256_v40, %v1196_v20  ;;  %v398_v44 = vstv %s1006_s8  ;;  %v443_v48 = vstv %s1009_s9  ;;  %v497_v52 = vstv %s1212_s10  ;;  %s1326_s22 = sld [smem:[#allocation6 + $0x8]]  ;;  %s1331_s23 = sld [smem:[#allocation6 + $0x14]] }
  0x3c   :  { %v127_v30 = vrot.slane %v120_v28, %v1207_v29  ;;  %v172_v31 = vrot.slane %v165_v27, %v1207_v29  ;;  %v216_v45 = vcombine.low %v1219_v38, %v1222_v39  ;;  %v1236_v46 = vmul.f32 %v398_v44, %v1199_v24  ;;  %s1333_s24 = sld [smem:[#allocation6 + $0x17]]  ;;  %s1335_s1 = sld [smem:[#allocation6 + $0x1a]] }
  0x3d   :  { %v1239_v47 = vmul.f32 %v398_v44, %v1201_v25  ;;  %v261_v49 = vcombine.low %v1226_v42, %v1229_v43  ;;  %v1244_v50 = vmul.f32 %v443_v48, %v1194_v19  ;;  %v1247_v51 = vmul.f32 %v443_v48, %v1196_v20  ;;  %s1337_s25 = sld [smem:[#allocation6]]  ;;  %s1339_s26 = sld [smem:[#allocation6 + $0x3]] }
  0x3e   :  { %v135_v32 = vrot.slane %v127_v30, %v1207_v29  ;;  %v128_v33 = vcombine.high %v127_v30, %v127_v30  ;;  %v173_v34 = vcombine.high %v172_v31, %v172_v31  ;;  %v180_v37 = vrot.slane %v172_v31, %v1207_v29  ;;  %s1341_s27 = sld [smem:[#allocation6 + $0x6]]  ;;  %s1343_s28 = sld [smem:[#allocation6 + $0x12]] }
  0x3f   :  { %v403_v53 = vcombine.low %v1236_v46, %v1239_v47  ;;  %v1253_v54 = vmul.f32 %v497_v52, %v1199_v24  ;;  %v448_v55 = vcombine.low %v1244_v50, %v1247_v51  ;;  %v1258_v56 = vmul.f32 %v497_v52, %v1201_v25  ;;  %s1345_s29 = sld [smem:[#allocation6 + $0x15]]  ;;  %s1350_s30 = sld [smem:[#allocation6 + $0x18]] }
  0x40   :  { %154 = vrot.lane.b32.xlu1 %v135_v32, %s1149_s11  ;;  %145 = vrot.lane.b32.xlu0 %v135_v32, %s1150_s12  ;;  %v142_v35 = vrot.slane %v128_v33, %v1207_v29  ;;  %v187_v41 = vrot.slane %v173_v34, %v1207_v29  ;;  %v542_v58 = vstv %s1015_s13  ;;  %v683_v61 = vstv %s1024_s14  ;;  %s1352_s4 = sld [smem:[#allocation6 + $0x9]]  ;;  %s1354_s5 = sld [smem:[#allocation6 + $0xb]] }
  0x41   :  { %v502_v57 = vcombine.low %v1253_v54, %v1258_v56  ;;  %v1267_v59 = vmul.f32 %v542_v58, %v1194_v19  ;;  %v1270_v60 = vmul.f32 %v542_v58, %v1196_v20  ;;  %v1275_v63 = vmul.f32 %v683_v61, %v1199_v24  ;;  %s1356_s6 = sld [smem:[#allocation6 + $0xf]]  ;;  %s1358_s0 = sld [smem:[#allocation6 + $0x11]] }
  0x42   :  { %v1278_v0 = vmul.f32 %v683_v61, %v1201_v25  ;;  %v728_v1 = vstv %s1027_s15  ;;  %v308_v2 = vstv %s1000_s16  ;;  %v353_v8 = vstv %s1003_s17  ;;  %s1360_s2 = sld [smem:[#allocation6 + $0x1b]]  ;;  %s1389_s7 = sld [smem:[#allocation6 + $0x1d]] }
  0x43   :  { %v547_v62 = vcombine.low %v1267_v59, %v1270_v60  ;;  %v1283_v4 = vmul.f32 %v728_v1, %v1194_v19  ;;  %v1286_v5 = vmul.f32 %v728_v1, %v1196_v20  ;;  %v1289_v6 = vmul.f32 %v308_v2, %v1199_v24  ;;  %s1409_s8 = sld [smem:[#allocation6 + $0x21]]  ;;  %s1411_s9 = sld [smem:[#allocation6 + $0x23]] }
  0x44   :  { %156 = vrot.lane.b32.xlu1 %v142_v35, %s1149_s11  ;;  %147 = vrot.lane.b32.xlu0 %v142_v35, %s1150_s12  ;;  %v688_v3 = vcombine.low %v1275_v63, %v1278_v0  ;;  %v1292_v7 = vmul.f32 %v308_v2, %v1201_v25  ;;  %v1299_v11 = vmul.f32 %v353_v8, %v1194_v19  ;;  %v593_v15 = vstv %s1018_s18  ;;  %s1419_s10 = sld [smem:[#allocation6 + $0xc]]  ;;  %s1421_s13 = sld [smem:[#allocation6 + $0xe]] }
  0x45   :  { %v733_v9 = vcombine.low %v1283_v4, %v1286_v5  ;;  %v1302_v13 = vmul.f32 %v353_v8, %v1196_v20  ;;  %v1307_v16 = vmul.f32 %v593_v15, %v1199_v24  ;;  %v1310_v17 = vmul.f32 %v593_v15, %v1201_v25  ;;  %s1698_s14 = sld [smem:[#allocation6 + $0x1e]]  ;;  %s1723_s15 = sld [smem:[#allocation6 + $0x20]] }
  0x46   :  { %v313_v10 = vcombine.low %v1289_v6, %v1292_v7  ;;  %v638_v18 = vstv %s1021_s19  ;;  %v1329_v24 = vand.u32 127, %v2009_v12  ;;  %v244_v27 = vstv %s1322_s20  ;;  %s1151_s16 = smov 16   ;;  %s1152_s17 = smov 112  }
  0x47   :  { %v358_v14 = vcombine.low %v1299_v11, %v1302_v13  ;;  %v598_v21 = vcombine.low %v1307_v16, %v1310_v17  ;;  %v1315_v22 = vmul.f32 %v638_v18, %v1194_v19  ;;  %v1318_v23 = vmul.f32 %v638_v18, %v1196_v20  ;;  %s1863_s18 = sld [smem:[#allocation7 + $0x1]]  ;;  %s1865_s19 = sld [smem:[#allocation7 + $0x4]] }
  0x48   :  { %192 = vrot.lane.b32.xlu1 %v187_v41, %s1150_s12  ;;  %190 = vrot.lane.b32.xlu0 %v180_v37, %s1150_s12  ;;  %2026 = vst [vmem:[#allocation14_spill] sm:$0xff] %v1329_v24  ;;  %v1348_v19 = vadd.s32 128, %v1329_v24  ;;  %v90_v20 = vand.u32 15, %v1329_v24  ;;  %v341_v28 = vstv %s1324_s21  ;;  %v431_v30 = vstv %s1326_s22  ;;  %s1867_s20 = sld [smem:[#allocation7 + $0x7]]  ;;  %s1869_s21 = sld [smem:[#allocation7 + $0xa]] }
  0x49   :  { %v643_v26 = vcombine.low %v1315_v22, %v1318_v23  ;;  %v530_v31 = vstv %s1331_s23  ;;  %v1372_v32 = vrot.slane %v216_v45, %v1207_v29  ;;  %v1378_v33 = vrot.slane %v261_v49, %v1207_v29  ;;  %s1871_s22 = sld [smem:[#allocation7 + $0x10]] }
  0x4a   :  { %2027 = vst [vmem:[#allocation15_spill] sm:$0xff] %v1348_v19  ;;  %v97_v25 = vand.u32 15, %v1348_v19  ;;  %v626_v34 = vstv %s1333_s24  ;;  %v716_v35 = vstv %s1335_s1  ;;  %v207_v36 = vstv %s1337_s25  ;;  %s1875_s23 = sld [smem:[#allocation7]]  ;;  %s1879_s24 = sld [smem:[#allocation7 + $0x6]] }
  0x4b   :  { %v304_v38 = vstv %s1339_s26  ;;  %v394_v39 = vstv %s1341_s27  ;;  %v493_v40 = vstv %s1343_s28  ;;  %v2010_v42 = vstv %s1345_s29  ;;  %s1881_s1 = sld [smem:[#allocation7 + $0x2]]  ;;  %s1883_s25 = sld [smem:[#allocation7 + $0x5]] }
  0x4c   :  { %200 = vrot.lane.b32.xlu1 %v187_v41, %s1149_s11  ;;  %198 = vrot.lane.b32.xlu0 %v180_v37, %s1149_s11  ;;  %v1387_v37 = vrot.slane %v403_v53, %v1207_v29  ;;  %v1398_v41 = vrot.slane %v448_v55, %v1207_v29  ;;  %v2013_v43 = vstv %s1350_s30  ;;  %v1407_v45 = vrot.slane %v502_v57, %v1207_v29  ;;  %s1885_s26 = sld [smem:[#allocation7 + $0x8]]  ;;  %s1887_s27 = sld [smem:[#allocation7 + $0x9]] }
  0x4d   :  { %v224_v46 = vcombine.high %v1372_v32, %v1372_v32  ;;  %v269_v47 = vcombine.high %v1378_v33, %v1378_v33  ;;  %vm158_vm0 = vcmp.lt.s32.totalorder %v1329_v24, 127  ;;  %vm149_vm1 = vcmp.lt.s32.totalorder %v1329_v24, 1  ;;  %s1889_s28 = sld [smem:[#allocation7 + $0xc]] }
  0x4e   :  { %v411_v51 = vcombine.high %v1387_v37, %v1387_v37  ;;  %v1434_v53 = vrot.slane %v547_v62, %v1207_v29  ;;  %vm1436_vm2 = vcmp.ne.s32.totalorder %v90_v20, 15  ;;  %v2028_v54 = vmov 0 }
  0x4f   :  { %v2029_v54 = vsel %vm1436_vm2, 4294967295, %v2028_v54  ;;  %vm1440_vm3 = vcmp.ne.s32.totalorder %v97_v25, 15  ;;  %v2031_v55 = vmov 0  ;;  %v456_v56 = vcombine.high %v1398_v41, %v1398_v41 }
  0x50   :  { %2030 = vst [vmem:[#allocation16_spill] sm:$0xff] %v2029_v54  ;;  %v2032_v55 = vsel %vm1440_vm3, 4294967295, %v2031_v55  ;;  %v1451_v58 = vrot.slane %v688_v3, %v1207_v29  ;;  %v1457_v59 = vrot.slane %v733_v9, %v1207_v29  ;;  %vm1459_vm4 = vcmp.ne.s32.totalorder %v90_v20, 0 }
  0x51   :  { %2033 = vst [vmem:[#allocation17_spill] sm:$0xff] %v2032_v55  ;;  %v2034_v60 = vmov 0  ;;  %vm1463_vm5 = vcmp.ne.s32.totalorder %v97_v25, 0  ;;  %v2037_v61 = vmov 0  ;;  %v510_v63 = vcombine.high %v1407_v45, %v1407_v45 }
  0x52   :  { %v2035_v60 = vsel %vm1459_vm4, 4294967295, %v2034_v60  ;;  %v2038_v61 = vsel %vm1463_vm5, 4294967295, %v2037_v61  ;;  %v1475_v0 = vrot.slane %v313_v10, %v1207_v29  ;;  %v1481_v1 = vrot.slane %v358_v14, %v1207_v29 }
  0x53   :  { %2036 = vst [vmem:[#allocation18_spill] sm:$0xff] %v2035_v60  ;;  %2039 = vst [vmem:[#allocation19_spill] sm:$0xff] %v2038_v61  ;;  %v1484_v2 = vrot.slane %v224_v46, %v1207_v29  ;;  %v1487_v3 = vrot.slane %v269_v47, %v1207_v29  ;;  %v1494_v6 = vrot.slane %v411_v51, %v1207_v29 }
  0x54   :  { %v555_v7 = vcombine.high %v1434_v53, %v1434_v53  ;;  %v1503_v9 = vrot.slane %v598_v21, %v1207_v29  ;;  %v1506_v10 = vrot.slane %v456_v56, %v1207_v29  ;;  %v696_v13 = vcombine.high %v1451_v58, %v1451_v58 }
  0x55   :  { %v741_v14 = vcombine.high %v1457_v59, %v1457_v59  ;;  %v1515_v20 = vrot.slane %v510_v63, %v1207_v29  ;;  %v321_v17 = vcombine.high %v1475_v0, %v1475_v0  ;;  %v366_v21 = vcombine.high %v1481_v1, %v1481_v1 }
  0x56   :  { %v1528_v56 = vrot.slane %v555_v7, %v1207_v29  ;;  %v606_v12 = vcombine.high %v1503_v9, %v1503_v9  ;;  %v1538_v16 = vrot.slane %v643_v26, %v1207_v29  ;;  %v1541_v25 = vrot.slane %v696_v13, %v1207_v29 }
  0x57   :  { %v1544_v51 = vrot.slane %v741_v14, %v1207_v29  ;;  %v1551_v8 = vrot.slane %v321_v17, %v1207_v29  ;;  %v1556_v23 = vrot.slane %v366_v21, %v1207_v29 }
  0x58   :  { %2040 = vst [vmem:[#allocation20_spill] sm:$0xff] %v1538_v16  ;;  %v1573_v26 = vrot.slane %v606_v12, %v1207_v29 }
  0xb2   :  { %v155_v15 = vpop.permute.xlu1 %154  ;;  %v146_v18 = vpop.permute.xlu0 %145 }
  0xb6   :  { %v157_v46 = vpop.permute.xlu1 %156  ;;  %v148_v63 = vpop.permute.xlu0 %147 }
  0xb7   :  { %v159_v13 = vsel %vm158_vm0, %v155_v15, %v157_v46  ;;  %v160_v14 = vsel %vm158_vm0, %v157_v46, %v155_v15  ;;  %v150_v17 = vsel %vm149_vm1, %v146_v18, %v148_v63  ;;  %v151_v22 = vsel %vm149_vm1, %v148_v63, %v146_v18 }
  0xb8   :  { %v161_v21 = vsel %vm1436_vm2, %v159_v13, 0.0  ;;  %v162_v7 = vsel %vm1440_vm3, %v160_v14, 0.0  ;;  %v152_v18 = vsel %vm1459_vm4, %v151_v22, 0.0  ;;  %v1583_v63 = vsel %vm1463_vm5, %v150_v17, 0.0 }
  0xb9   :  { %v245_v46 = vmul.f32 %v244_v27, %v161_v21  ;;  %v246_v13 = vmul.f32 %v244_v27, %v162_v7  ;;  %v1591_v14 = vmul.f32 %v341_v28, %v161_v21  ;;  %v1595_v15 = vmul.f32 %v341_v28, %v162_v7 }
  0xba   :  { %v432_v22 = vmul.f32 %v431_v30, %v161_v21  ;;  %v193_v17 = vpop.permute.xlu1 %192  ;;  %v191_v47 = vpop.permute.xlu0 %190  ;;  %v433_v12 = vmul.f32 %v431_v30, %v162_v7  ;;  %v531_v27 = vmul.f32 %v530_v31, %v161_v21  ;;  %v532_v5 = vmul.f32 %v530_v31, %v162_v7 }
  0xbb   :  { %v1607_v62 = vmul.f32 %v626_v34, %v161_v21  ;;  %v1611_v28 = vmul.f32 %v626_v34, %v162_v7  ;;  %v1615_v11 = vmul.f32 %v716_v35, %v161_v21  ;;  %v1619_v52 = vmul.f32 %v716_v35, %v162_v7 }
  0xbc   :  { %v208_v57 = vmul.f32 %v207_v36, %v152_v18  ;;  %v209_v30 = vmul.f32 %v207_v36, %v1583_v63  ;;  %v1628_v31 = vmul.f32 %v304_v38, %v152_v18  ;;  %v1633_v4 = vmul.f32 %v304_v38, %v1583_v63 }
  0xbd   :  { %v395_v34 = vmul.f32 %v394_v39, %v152_v18  ;;  %v396_v21 = vmul.f32 %v394_v39, %v1583_v63  ;;  %v494_v35 = vmul.f32 %v493_v40, %v152_v18  ;;  %v495_v7 = vmul.f32 %v493_v40, %v1583_v63 }
  0xbe   :  { %v1647_v36 = vmul.f32 %v2010_v42, %v152_v18  ;;  %v201_v48 = vpop.permute.xlu1 %200  ;;  %v199_v49 = vpop.permute.xlu0 %198  ;;  %v194_v38 = vsel %vm149_vm1, %v191_v47, %v193_v17  ;;  %v195_v39 = vsel %vm149_vm1, %v193_v17, %v191_v47  ;;  %v680_v42 = vmul.f32 %v2013_v43, %v152_v18 }
  0xbf   :  { %v202_v50 = vsel %vm158_vm0, %v199_v49, %v201_v48  ;;  %v203_v40 = vsel %vm158_vm0, %v201_v48, %v199_v49  ;;  %v1661_v44 = vsel %vm1459_vm4, %v195_v39, 0.0  ;;  %v1665_v19 = vsel %vm1463_vm5, %v194_v38, 0.0 }
  0xc0   :  { %v1669_v47 = vsel %vm1440_vm3, %v203_v40, 0.0  ;;  %v1673_v17 = vsel %vm1436_vm2, %v202_v50, 0.0  ;;  %v242_v48 = vadd.f32 %v1484_v2, %v209_v30  ;;  %v2041_v49 = vstv %s1352_s4  ;;  %s1895_s4 = sld [smem:[#allocation7 + $0xe]] }
  0xc1   :  { %v252_v18 = vmul.f32 %v2041_v49, %v1665_v19  ;;  %v2042_v39 = vrot.slane %v1372_v32, %v1207_v29  ;;  %v2043_v38 = vstv %s1350_s30  ;;  %v2044_v40 = vmov %v2041_v49  ;;  %s1893_s30 = sld [smem:[#allocation7 + $0xb]] }
  0xc2   :  { %v681_v61 = vmul.f32 %v2043_v38, %v1583_v63  ;;  %v251_v55 = vmul.f32 %v2044_v40, %v1661_v44  ;;  %v429_v54 = vadd.f32 %v1494_v6, %v396_v21  ;;  %v2045_v50 = vstv %s1356_s6  ;;  %s1153_s6 = smov [#allocation9]  }
  0xc3   :  { %v241_v43 = vadd.f32 %v2042_v39, %v208_v57  ;;  %v439_v2 = vmul.f32 %v2045_v50, %v1665_v19  ;;  %v248_v30 = vadd.f32 %v246_v13, %v242_v48  ;;  %v2046_v49 = vstv %s1354_s5  ;;  %s1897_s5 = sld [smem:[#allocation7 + $0x11]] }
  0xc4   :  { %v291_v60 = vmul.f32 %v2046_v49, %v1669_v47  ;;  %v2047_v32 = vrot.slane %v1387_v37, %v1207_v29  ;;  %v2048_v39 = vmov %v2046_v49  ;;  %v435_v6 = vadd.f32 %v433_v12, %v429_v54 }
  0xc5   :  { %v247_v24 = vadd.f32 %v245_v46, %v241_v43  ;;  %v290_v38 = vmul.f32 %v2048_v39, %v1673_v17  ;;  %v2049_v21 = vmov %v2045_v50  ;;  %v528_v13 = vadd.f32 %v1515_v20, %v495_v7 }
  0xc6   :  { %v428_v57 = vadd.f32 %v2047_v32, %v395_v34  ;;  %v438_v40 = vmul.f32 %v2049_v21, %v1661_v44  ;;  %v254_v48 = vadd.f32 %v252_v18, %v248_v30  ;;  %v2050_v46 = vstv %s1360_s2 }
  0xc7   :  { %v253_v50 = vadd.f32 %v251_v55, %v247_v24  ;;  %v538_v37 = vmul.f32 %v2050_v46, %v1665_v19  ;;  %v441_v34 = vadd.f32 %v439_v2, %v435_v6  ;;  %v2051_v49 = vstv %s1358_s0  ;;  %s980_s0 = sshll.u32 %s1153_s6, 4  ;;  %s981_s0 = int_to_ptr.vmem [resolvable:$true] %s980_s0 }
  0xc8   :  { %v434_v43 = vadd.f32 %v432_v22, %v428_v57  ;;  %v478_v32 = vmul.f32 %v2051_v49, %v1669_v47  ;;  %v534_v16 = vadd.f32 %v532_v5, %v528_v13  ;;  %v2052_v54 = vrot.slane %v1407_v45, %v1207_v29  ;;  %s1113_s2 = scalar_lea.vmem %s981_s0, 64  ;;  %p1118_p5 = scmp.lt.s32.totalorder %s981_s0, %s981_s0 }
  0xc9   :  { %v287_v39 = vadd.f32 %v1487_v3, %v254_v48  ;;  %v2053_v20 = vrot.slane %v1378_v33, %v1207_v29  ;;  %v2054_v22 = vmov %v2050_v46  ;;  %v474_v5 = vadd.f32 %v1506_v10, %v441_v34  ;;  %p1114_p4 = scmp.ne.s32.totalorder %s981_s0, %s1113_s2  ;;  %p1119_p6 = scmp.lt.s32.totalorder %s1113_s2, %s1113_s2 }
  0xca   :  { %v527_v12 = vadd.f32 %v2052_v54, %v494_v35  ;;  %v440_v55 = vadd.f32 %v438_v40, %v434_v43  ;;  %v537_v7 = vmul.f32 %v2054_v22, %v1661_v44  ;;  %v2055_v45 = vmov %v2051_v49 }
  0xcb   :  { %v286_v24 = vadd.f32 %v2053_v20, %v253_v50  ;;  %v477_v35 = vmul.f32 %v2055_v45, %v1673_v17  ;;  %v540_v18 = vadd.f32 %v538_v37, %v534_v16  ;;  %v293_v2 = vadd.f32 %v291_v60, %v287_v39  ;;  %p1120_p7 = por %p1119_p6, %p1118_p5 }
  0xcc   :  { %v533_v3 = vadd.f32 %v531_v27, %v527_v12  ;;  %v2056_v30 = vrot.slane %v1398_v41, %v1207_v29  ;;  %v714_v6 = vadd.f32 %v1541_v25, %v681_v61  ;;  %v2057_v10 = vstv %s1389_s7 }
  0xcd   :  { %v292_v33 = vadd.f32 %v290_v38, %v286_v24  ;;  %v573_v21 = vadd.f32 %v1528_v56, %v540_v18  ;;  %v577_v40 = vmul.f32 %v2057_v10, %v1669_v47  ;;  %v2058_v16 = vstv %s1409_s8  ;;  %296 = vrot.lane.b32.xlu1 %v293_v2, %s1151_s16  ;;  %p1121_p8 = pnand %p1120_p7, %p1114_p4 }
  0xce   :  { %v473_v57 = vadd.f32 %v2056_v30, %v440_v55  ;;  %v539_v13 = vadd.f32 %v537_v7, %v533_v3  ;;  %v724_v48 = vmul.f32 %v2058_v16, %v1665_v19  ;;  %v2059_v60 = vstv %s1345_s29  ;;  %s1891_s29 = sld [smem:[#allocation7 + $0xf]] }
  0xcf   :  { %v591_v27 = vmul.f32 %v2059_v60, %v1583_v63  ;;  %294 = vrot.lane.b32.xlu0 %v292_v33, %s1151_s16  ;;  %v2060_v41 = vmov %v2057_v10  ;;  %v720_v25 = vadd.f32 %v1619_v52, %v714_v6  ;;  %v632_v56 = vstv %s1698_s14 }
  0xd0   :  { %v576_v61 = vmul.f32 %v2060_v41, %v1673_v17  ;;  %v480_v38 = vadd.f32 %v478_v32, %v474_v5  ;;  %v2061_v50 = vrot.slane %v1434_v53, %v1207_v29  ;;  %v2062_v63 = vrot.slane %v1451_v58, %v1207_v29 }
  0xd1   :  { %v2063_v37 = vmov %v2058_v16  ;;  %v479_v49 = vadd.f32 %v477_v35, %v473_v57  ;;  %v726_v54 = vadd.f32 %v724_v48, %v720_v25  ;;  %v2064_v12 = vstv %s1411_s9 }
  0xd2   :  { %v572_v43 = vadd.f32 %v2061_v50, %v539_v13  ;;  %v713_v46 = vadd.f32 %v2062_v63, %v680_v42  ;;  %v723_v34 = vmul.f32 %v2063_v37, %v1661_v44  ;;  %v763_v52 = vmul.f32 %v2064_v12, %v1669_v47  ;;  %483 = vrot.lane.b32.xlu1 %v480_v38, %s1152_s17  ;;  %v2077_v50 = vld [vmem:[#allocation14_spill] sm:$0xff] }
  0xd3   :  { %v2065_v53 = vrot.slane %v1475_v0, %v1207_v29  ;;  %v579_v39 = vadd.f32 %v577_v40, %v573_v21  ;;  %v339_v42 = vadd.f32 %v1551_v8, %v1633_v4  ;;  %v2066_v20 = vstv %s1419_s10  ;;  %481 = vrot.lane.b32.xlu0 %v479_v49, %s1152_s17 }
  0xd4   :  { %v719_v58 = vadd.f32 %v1615_v11, %v713_v46  ;;  %v348_v24 = vmul.f32 %v2066_v20, %v1661_v44  ;;  %v759_v55 = vadd.f32 %v1544_v51, %v726_v54  ;;  %v671_v11 = vstv %s1723_s15 }
  0xd5   :  { %v338_v32 = vadd.f32 %v2065_v53, %v1628_v31  ;;  %v2067_v31 = vmov %v2066_v20  ;;  %v578_v7 = vadd.f32 %v576_v61, %v572_v43  ;;  %v2068_v4 = vmov %v2064_v12 }
  0xd6   :  { %v349_v22 = vmul.f32 %v2067_v31, %v1665_v19  ;;  %v725_v5 = vadd.f32 %v723_v34, %v719_v58  ;;  %v762_v8 = vmul.f32 %v2068_v4, %v1673_v17  ;;  %v345_v45 = vadd.f32 %v1595_v15, %v339_v42  ;;  %582 = vrot.lane.b32.xlu1 %v579_v39, %s1151_s16  ;;  %v2078_v34 = vld [vmem:[#allocation15_spill] sm:$0xff] }
  0xd7   :  { %v344_v0 = vadd.f32 %v1591_v14, %v338_v32  ;;  %v2069_v18 = vstv %s1421_s13  ;;  %v2071_v14 = vrot.slane %v1503_v9, %v1207_v29  ;;  %v2072_v30 = vrot.slane %v1457_v59, %v1207_v29  ;;  %580 = vrot.lane.b32.xlu0 %v578_v7, %s1151_s16 }
  0xd8   :  { %v387_v3 = vmul.f32 %v2069_v18, %v1673_v17  ;;  %v2070_v2 = vmov %v2069_v18  ;;  %v351_v6 = vadd.f32 %v349_v22, %v345_v45  ;;  %v624_v21 = vadd.f32 %v1573_v26, %v591_v27  ;;  %v2074_v26 = vld [vmem:[#allocation20_spill] sm:$0xff] }
  0xd9   :  { %v350_v35 = vadd.f32 %v348_v24, %v344_v0  ;;  %v388_v51 = vmul.f32 %v2070_v2, %v1669_v47  ;;  %v623_v33 = vadd.f32 %v2071_v14, %v1647_v36  ;;  %v758_v57 = vadd.f32 %v2072_v30, %v725_v5 }
  0xda   :  { %v633_v15 = vmul.f32 %v632_v56, %v1661_v44  ;;  %v2073_v10 = vrot.slane %v1481_v1, %v1207_v29  ;;  %v634_v36 = vmul.f32 %v632_v56, %v1665_v19  ;;  %v765_v13 = vadd.f32 %v763_v52, %v759_v55 }
  0xdb   :  { %v629_v9 = vadd.f32 %v1607_v62, %v623_v33  ;;  %v384_v59 = vadd.f32 %v1556_v23, %v351_v6  ;;  %v630_v16 = vadd.f32 %v1611_v28, %v624_v21  ;;  %v2075_v44 = vcombine.high %v2074_v26, %v2074_v26 }
  0xdc   :  { %v383_v40 = vadd.f32 %v2073_v10, %v350_v35  ;;  %v764_v60 = vadd.f32 %v762_v8, %v758_v57  ;;  %v672_v1 = vmul.f32 %v671_v11, %v1673_v17  ;;  %v673_v62 = vmul.f32 %v671_v11, %v1669_v47  ;;  %768 = vrot.lane.b32.xlu1 %v765_v13, %s1152_s17 }
  0xdd   :  { %v665_v48 = vrot.slane %v2075_v44, %v1207_v29  ;;  %v635_v41 = vadd.f32 %v633_v15, %v629_v9  ;;  %v390_v61 = vadd.f32 %v388_v51, %v384_v59  ;;  %v636_v25 = vadd.f32 %v634_v36, %v630_v16 }
  0xde   :  { %v389_v27 = vadd.f32 %v387_v3, %v383_v40  ;;  %766 = vrot.lane.b32.xlu0 %v764_v60, %s1152_s17  ;;  %v2076_v19 = vrot.slane %v2074_v26, %v1207_v29  ;;  %vm298_vm6 = vcmp.lt.s32.totalorder %v2077_v50, 16  ;;  %vm116_vm7 = vcmp.ge.s32.totalorder %v2077_v50, 16 }
  0xdf   :  { %v669_v28 = vadd.f32 %v665_v48, %v636_v25  ;;  %vm485_vm8 = vcmp.lt.s32.totalorder %v2077_v50, 112  ;;  %vm115_vm9 = vcmp.lt.s32.totalorder %v2078_v34, 240  ;;  %v813_v18 = vstv %s1863_s18 }
  0xe0   :  { %v668_v23 = vadd.f32 %v2076_v19, %v635_v41  ;;  %v855_v3 = vstv %s1865_s19  ;;  %v891_v2 = vstv %s1867_s20  ;;  %v831_v51 = vstv %s1869_s21 }
  0xe1   :  { %v675_v38 = vadd.f32 %v673_v62, %v669_v28  ;;  %v909_v14 = vstv %s1871_s22  ;;  %v809_v30 = vstv %s1875_s23  ;;  %v887_v6 = vstv %s1879_s24 }
  0xe2   :  { %v674_v56 = vadd.f32 %v672_v1, %v668_v23  ;;  %v819_v21 = vstv %s1881_s1  ;;  %v861_v9 = vstv %s1883_s25  ;;  %v897_v26 = vstv %s1885_s26 }
  0xe3   :  { %v825_v48 = vstv %s1887_s27  ;;  %v867_v60 = vstv %s1889_s28  ;;  %v837_v41 = vstv %s1893_s30  ;;  %v879_v25 = vstv %s1895_s4 }
 0x13f   :  { %v297_v17 = vpop.permute.xlu1 %296 }
 0x141   :  { %v295_v43 = vpop.permute.xlu0 %294 }
 0x142   :  { %v300_v47 = vsel %vm298_vm6, %v297_v17, %v295_v43  ;;  %v299_v63 = vsel %vm298_vm6, %v295_v43, %v297_v17 }
 0x143   :  { %v301_v46 = vsel %vm116_vm7, %v300_v47, 0.0  ;;  %v392_v12 = vadd.f32 %v390_v61, %v299_v63 }
 0x144   :  { %v391_v37 = vadd.f32 %v389_v27, %v301_v46  ;;  %v484_v49 = vpop.permute.xlu1 %483  ;;  %v903_v27 = vstv %s1891_s29 }
 0x145   :  { %v482_v54 = vpop.permute.xlu0 %481 }
 0x146   :  { %v486_v52 = vsel %vm485_vm8, %v482_v54, %v484_v49  ;;  %v487_v53 = vsel %vm485_vm8, %v484_v49, %v482_v54 }
 0x147   :  { %v489_v32 = vsel %vm115_vm9, %v487_v53, 0.0  ;;  %v490_v39 = vadd.f32 %v486_v52, %v391_v37 }
 0x148   :  { %v491_v58 = vadd.f32 %v489_v32, %v392_v12  ;;  %v583_v42 = vpop.permute.xlu1 %582 }
 0x149   :  { %776 = vrot.lane.b32.xlu0 %v490_v39, %s1150_s12  ;;  %v581_v20 = vpop.permute.xlu0 %580  ;;  %v814_v15 = vmul.f32 %v813_v18, %v490_v39  ;;  %v856_v10 = vmul.f32 %v855_v3, %v490_v39  ;;  %v892_v40 = vmul.f32 %v891_v2, %v490_v39 }
 0x14a   :  { %v585_v24 = vsel %vm298_vm6, %v583_v42, %v581_v20  ;;  %778 = vrot.lane.b32.xlu1 %v491_v58, %s1150_s12  ;;  %v584_v55 = vsel %vm298_vm6, %v581_v20, %v583_v42  ;;  %v815_v13 = vmul.f32 %v813_v18, %v491_v58  ;;  %v857_v59 = vmul.f32 %v855_v3, %v491_v58 }
 0x14b   :  { %v586_v0 = vsel %vm116_vm7, %v585_v24, 0.0  ;;  %v677_v7 = vadd.f32 %v675_v38, %v584_v55  ;;  %v893_v16 = vmul.f32 %v891_v2, %v491_v58  ;;  %v915_v38 = vstv %s1897_s5 }
 0x14c   :  { %v676_v31 = vadd.f32 %v674_v56, %v586_v0 }
 0x14d   :  { %784 = vrot.lane.b32.xlu0 %v490_v39, %s1149_s11 }
 0x14e   :  { %v769_v22 = vpop.permute.xlu1 %768  ;;  %786 = vrot.lane.b32.xlu1 %v491_v58, %s1149_s11 }
 0x150   :  { %v767_v11 = vpop.permute.xlu0 %766 }
 0x151   :  { %v770_v5 = vsel %vm485_vm8, %v767_v11, %v769_v22  ;;  %v771_v4 = vsel %vm485_vm8, %v769_v22, %v767_v11 }
 0x152   :  { %v773_v8 = vsel %vm115_vm9, %v771_v4, 0.0  ;;  %v1851_v45 = vadd.f32 %v770_v5, %v676_v31 }
 0x153   :  { %v1853_v35 = vadd.f32 %v773_v8, %v677_v7 }
 0x154   :  { %792 = vrot.lane.b32.xlu0 %v1851_v45, %s1150_s12  ;;  %v1921_v62 = vmul.f32 %v831_v51, %v1851_v45  ;;  %v1929_v17 = vmul.f32 %v909_v14, %v1851_v45 }
 0x155   :  { %794 = vrot.lane.b32.xlu1 %v1853_v35, %s1150_s12  ;;  %s1873_s12 = sld [smem:[#allocation7 + $0xd]]  ;;  %v833_v52 = vmul.f32 %v831_v51, %v1853_v35  ;;  %v911_v53 = vmul.f32 %v909_v14, %v1853_v35 }
 0x158   :  { %800 = vrot.lane.b32.xlu0 %v1851_v45, %s1149_s11 }
 0x159   :  { %802 = vrot.lane.b32.xlu1 %v1853_v35, %s1149_s11  ;;  %s1877_s11 = sld [smem:[#allocation7 + $0x3]] }
 0x15b   :  { %v873_v33 = vstv %s1873_s12 }
 0x15c   :  { %v874_v58 = vmul.f32 %v873_v33, %v1851_v45  ;;  %v875_v42 = vmul.f32 %v873_v33, %v1853_v35 }
 0x15f   :  { %v851_v57 = vstv %s1877_s11 }
 0x1bb   :  { %v777_v36 = vpop.permute.xlu0 %776 }
 0x1bc   :  { %v779_v44 = vpop.permute.xlu1 %778 }
 0x1bd   :  { %v780_v1 = vsel %vm149_vm1, %v777_v36, %v779_v44  ;;  %v781_v61 = vsel %vm149_vm1, %v779_v44, %v777_v36 }
 0x1be   :  { %v782_v23 = vsel %vm1459_vm4, %v781_v61, 0.0  ;;  %v783_v56 = vsel %vm1463_vm5, %v780_v1, 0.0 }
 0x1bf   :  { %v810_v43 = vmul.f32 %v809_v30, %v782_v23  ;;  %v811_v47 = vmul.f32 %v809_v30, %v783_v56  ;;  %v852_v63 = vmul.f32 %v851_v57, %v782_v23  ;;  %v853_v46 = vmul.f32 %v851_v57, %v783_v56  ;;  %v785_v37 = vpop.permute.xlu0 %784 }
 0x1c0   :  { %v888_v49 = vmul.f32 %v887_v6, %v782_v23  ;;  %v889_v54 = vmul.f32 %v887_v6, %v783_v56  ;;  %v787_v12 = vpop.permute.xlu1 %786 }
 0x1c1   :  { %v858_v32 = vadd.f32 %v856_v10, %v852_v63  ;;  %v859_v39 = vadd.f32 %v857_v59, %v853_v46  ;;  %v816_v20 = vadd.f32 %v814_v15, %v810_v43  ;;  %v817_v24 = vadd.f32 %v815_v13, %v811_v47 }
 0x1c2   :  { %v788_v55 = vsel %vm158_vm0, %v785_v37, %v787_v12  ;;  %v789_v0 = vsel %vm158_vm0, %v787_v12, %v785_v37  ;;  %v894_v31 = vadd.f32 %v892_v40, %v888_v49  ;;  %v895_v22 = vadd.f32 %v893_v16, %v889_v54 }
 0x1c3   :  { %v790_v7 = vsel %vm1436_vm2, %v788_v55, 0.0  ;;  %v791_v4 = vsel %vm1440_vm3, %v789_v0, 0.0 }
 0x1c4   :  { %v820_v45 = vmul.f32 %v819_v21, %v790_v7  ;;  %v821_v18 = vmul.f32 %v819_v21, %v791_v4  ;;  %v862_v35 = vmul.f32 %v861_v9, %v790_v7  ;;  %v863_v3 = vmul.f32 %v861_v9, %v791_v4 }
 0x1c5   :  { %v898_v51 = vmul.f32 %v897_v26, %v790_v7  ;;  %v899_v14 = vmul.f32 %v897_v26, %v791_v4 }
 0x1c6   :  { %v793_v8 = vpop.permute.xlu0 %792  ;;  %v822_v57 = vadd.f32 %v820_v45, %v816_v20  ;;  %v823_v6 = vadd.f32 %v821_v18, %v817_v24  ;;  %v864_v15 = vadd.f32 %v862_v35, %v858_v32  ;;  %v865_v10 = vadd.f32 %v863_v3, %v859_v39 }
 0x1c7   :  { %v795_v2 = vpop.permute.xlu1 %794  ;;  %v900_v40 = vadd.f32 %v898_v51, %v894_v31  ;;  %v901_v36 = vadd.f32 %v899_v14, %v895_v22 }
 0x1c8   :  { %v796_v33 = vsel %vm149_vm1, %v793_v8, %v795_v2  ;;  %v797_v30 = vsel %vm149_vm1, %v795_v2, %v793_v8 }
 0x1c9   :  { %v798_v21 = vsel %vm1459_vm4, %v797_v30, 0.0  ;;  %v799_v9 = vsel %vm1463_vm5, %v796_v33, 0.0 }
 0x1ca   :  { %v801_v13 = vpop.permute.xlu0 %800  ;;  %v826_v59 = vmul.f32 %v825_v48, %v798_v21  ;;  %v827_v16 = vmul.f32 %v825_v48, %v799_v9  ;;  %v868_v26 = vmul.f32 %v867_v60, %v798_v21  ;;  %v869_v44 = vmul.f32 %v867_v60, %v799_v9 }
 0x1cb   :  { %v803_v1 = vpop.permute.xlu1 %802  ;;  %v904_v61 = vmul.f32 %v903_v27, %v798_v21  ;;  %v905_v23 = vmul.f32 %v903_v27, %v799_v9  ;;  %v2083_v9 = vlaneseq }
 0x1cc   :  { %v804_v56 = vsel %vm158_vm0, %v801_v13, %v803_v1  ;;  %v805_v19 = vsel %vm158_vm0, %v803_v1, %v801_v13  ;;  %v828_v28 = vadd.f32 %v826_v59, %v822_v57  ;;  %v829_v43 = vadd.f32 %v827_v16, %v823_v6 }
 0x1cd   :  { %v870_v47 = vadd.f32 %v868_v26, %v864_v15  ;;  %v871_v48 = vadd.f32 %v869_v44, %v865_v10  ;;  %v906_v63 = vadd.f32 %v904_v61, %v900_v40  ;;  %v907_v46 = vadd.f32 %v905_v23, %v901_v36 }
 0x1ce   :  { %v806_v60 = vsel %vm1436_vm2, %v804_v56, 0.0  ;;  %v807_v27 = vsel %vm1440_vm3, %v805_v19, 0.0  ;;  %v835_v32 = vadd.f32 %v833_v52, %v829_v43  ;;  %v834_v39 = vadd.f32 %v1921_v62, %v828_v28 }
 0x1cf   :  { %v838_v37 = vmul.f32 %v837_v41, %v806_v60  ;;  %v839_v49 = vmul.f32 %v837_v41, %v807_v27  ;;  %v880_v54 = vmul.f32 %v879_v25, %v806_v60  ;;  %v881_v12 = vmul.f32 %v879_v25, %v807_v27 }
 0x1d0   :  { %v913_v20 = vadd.f32 %v911_v53, %v907_v46  ;;  %v912_v24 = vadd.f32 %v1929_v17, %v906_v63  ;;  %v876_v55 = vadd.f32 %v874_v58, %v870_v47  ;;  %v877_v0 = vadd.f32 %v875_v42, %v871_v48 }
 0x1d1   :  { %v916_v31 = vmul.f32 %v915_v38, %v806_v60  ;;  %v917_v22 = vmul.f32 %v915_v38, %v807_v27  ;;  %v841_v11 = vadd.f32 %v839_v49, %v835_v32  ;;  %v840_v7 = vadd.f32 %v838_v37, %v834_v39 }
 0x1d2   :  { %v882_v5 = vadd.f32 %v880_v54, %v876_v55  ;;  %v883_v41 = vadd.f32 %v881_v12, %v877_v0  ;;  %vm971_vm10 = vcmp.lt.s32.totalorder %v2083_v9, 256 }
 0x1d3   :  { %844 = vrot.lane.b32.xlu1 %v841_v11, %s1151_s16  ;;  %842 = vrot.lane.b32.xlu0 %v840_v7, %s1151_s16  ;;  %v919_v25 = vadd.f32 %v917_v22, %v913_v20  ;;  %v918_v52 = vadd.f32 %v916_v31, %v912_v24 }
 0x1d7   :  { %922 = vrot.lane.b32.xlu1 %v919_v25, %s1152_s17  ;;  %920 = vrot.lane.b32.xlu0 %v918_v52, %s1152_s17 }
 0x245   :  { %v845_v62 = vpop.permute.xlu1 %844  ;;  %v843_v17 = vpop.permute.xlu0 %842 }
 0x246   :  { %v847_v53 = vsel %vm298_vm6, %v845_v62, %v843_v17  ;;  %v846_v38 = vsel %vm298_vm6, %v843_v17, %v845_v62 }
 0x247   :  { %v848_v58 = vsel %vm116_vm7, %v847_v53, 0.0  ;;  %v885_v45 = vadd.f32 %v883_v41, %v846_v38 }
 0x248   :  { %v884_v42 = vadd.f32 %v882_v5, %v848_v58 }
 0x249   :  { %v923_v4 = vpop.permute.xlu1 %922  ;;  %v921_v8 = vpop.permute.xlu0 %920 }
 0x24a   :  { %v924_v18 = vsel %vm485_vm8, %v921_v8, %v923_v4  ;;  %v925_v35 = vsel %vm485_vm8, %v923_v4, %v921_v8 }
 0x24b   :  { %v927_v3 = vsel %vm115_vm9, %v925_v35, 0.0  ;;  %v928_v2 = vadd.f32 %v924_v18, %v884_v42 }
 0x24c   :  { %v929_v51 = vadd.f32 %v927_v3, %v885_v45 }
 0x24d   :  { %v930_v14 = vsub.f32 0.0, %v928_v2 }
 0x24e   :  { %v931_v33 = vsub.f32 0.0, %v929_v51 }
 0x24f   :  { %v932_v30 = vmul.f32 1.442695, %v930_v14 }
 0x250   :  { %v934_v57 = vmul.f32 1.442695, %v931_v33 }
 0x251   :  { %1059 = vpow2.f32 %v932_v30 }
 0x252   :  { %1061 = vpow2.f32 %v934_v57 }
 0x25b   :  { %v1060_v6 = vpop.eup %1059 }
 0x25c   :  { %v1062_v15 = vpop.eup %1061  ;;  %v936_v10 = vadd.f32 1.0, %v1060_v6 }
 0x25d   :  { %v937_v40 = vadd.f32 1.0, %v1062_v15 }
 0x25e   :  { %1063 = vrcp.f32 %v936_v10 }
 0x25f   :  { %1065 = vrcp.f32 %v937_v40 }
 0x268   :  { %v1064_v36 = vpop.eup %1063 }
 0x269   :  { %v1066_v50 = vpop.eup %1065 }
 0x26a   :  { %v944_v21 = vcombine.low %v1064_v36, %v1066_v50 }
 0x26c   :  { %v951_v34 = vrot.slane %v944_v21, %v1207_v29 }
 0x26e   :  { %v952_v13 = vcombine.high %v951_v34, %v951_v34  ;;  %v959_v59 = vrot.slane %v951_v34, %v1207_v29 }
 0x270   :  { %v966_v16 = vrot.slane %v952_v13, %v1207_v29  ;;  %973 = vst.msk [vmem:[#allocation9] sm:$0x3] %vm971_vm10, %v959_v59 }
 0x272   :  { %974 = vst.msk [vmem:[#allocation9 + $0x2] sm:$0x3] %vm971_vm10, %v966_v16 }
 0x273   :  { %1124 = shalt.err (!%p1121_p8)
}
 0x274   :  { %s1125_s9 = scalar_lea.hbm %s2008_s3, 64 }
 0x275   :  { %p1126_p9 = scmp.ne.s32.totalorder %s2008_s3, %s1125_s9  ;;  %p1129_p10 = scmp.lt.u32.totalorder %s1125_s9, %s2008_s3 }
 0x277   :  { %p1131_p11 = pnand %p1129_p10, %p1126_p9 }
 0x279   :  { %1134 = shalt.err (!%p1131_p11)
}
 0x27a   :  { %s1154_s16 = smov 32   ;;  %s1155_s17 = smov 2  }
 0x27b   :  { %986 = dma.vmem_to_hbm [thread:$0]  %s981_s0, 64, %s2008_s3, [#allocation4], %s1154_s16, %s1154_s16, %s1155_s17  }
 0x27c   :  { %1141 = dma.done.wait [#allocation4], 64  }
 0x27d   :  { %1142 = vsyncadd [#allocation4], 4294967232 }
 0x27e   :  { %990 = vsyncpa [#allocation3], 1 }
 0x27f   :  { %991 = vsyncpa [#allocation4], 1 }
 0x280   :  { %992 = vsyncpa [#allocation5], 1 }
 0x281   :  { %993 = vsyncpa [#allocation8], 1 }

</bundles_post_ra>
